<compile_context>
chip_gen: v6e
topology: v6e:2x2x1
jax: 0.10.0
libtpu: 0.0.40
codegen_flags: <defaults>
</compile_context>

<pallas_src>
import math
from functools import partial

import jax
import jax.numpy as jnp
from jax.experimental import pallas as pl
from jax.experimental.pallas import tpu as pltpu


def _patch_embed_kernel(a_ref, w_ref, b_ref, o_ref):
    # a_ref: (tile_m, Kp) bf16 patch rows; w_ref: (Kp, Ep) bf16 (VMEM-resident);
    # b_ref: (1, Ep) f32 (resident).  MXU matmul, f32 accumulate, f32 bias add.
    acc = jnp.dot(a_ref[...], w_ref[...], preferred_element_type=jnp.float32)
    o_ref[...] = (acc + b_ref[...]).astype(o_ref.dtype)


def patch_embed_matmul(patches, weight, bias_row):
    """patches (Mp,Kp) bf16 @ weight (Kp,Ep) bf16 + bias (1,Ep) f32 -> (Mp,Ep) f32."""
    Mp, Kp = patches.shape
    Kw, Ep = weight.shape
    assert Kw == Kp and bias_row.shape == (1, Ep)

    # tile_m from a VMEM budget: double-buffered A tile + resident weight +
    # double-buffered f32 out tile must stay well inside the 32 MiB scoped
    # default (and v7x's 64 MiB physical VMEM).
    budget = 18 * 1024 * 1024
    resident = Kp * Ep * 2 + Ep * 4
    per_row = 2 * Kp * 2 + 2 * Ep * 4
    vmem_rows = max(16, (budget - resident) // per_row)

    if Mp <= 128:
        # Single grid step; full-dim block (allowed even if not 8/16-aligned).
        tile_m = Mp
    else:
        half = -(-Mp // 2)               # >= 2 grid steps -> both v7x TCs busy
        half = -(-half // 16) * 16       # bf16 sublane alignment for the A tile
        tile_m = max(16, min(2048, (vmem_rows // 16) * 16, half))

    # No padding of M: Pallas masks the out-of-range rows of the partial last
    # output tile, so they never reach HBM.
    grid_m = pl.cdiv(Mp, tile_m)

    return pl.pallas_call(
        _patch_embed_kernel,
        out_shape=jax.ShapeDtypeStruct((Mp, Ep), jnp.float32),
        grid_spec=pltpu.PrefetchScalarGridSpec(
            num_scalar_prefetch=0,
            grid=(grid_m,),
            in_specs=[
                pl.BlockSpec((tile_m, Kp), lambda i: (i, 0)),
                pl.BlockSpec((Kp, Ep), lambda i: (0, 0)),   # constant -> VMEM-resident
                pl.BlockSpec((1, Ep), lambda i: (0, 0)),    # constant -> VMEM-resident
            ],
            out_specs=pl.BlockSpec((tile_m, Ep), lambda i: (i, 0)),
        ),
        compiler_params=pltpu.CompilerParams(
            dimension_semantics=("parallel",),              # shard M tiles across TCs
            vmem_limit_bytes=32 * 1024 * 1024,
        ),
        cost_estimate=pl.CostEstimate(
            flops=2 * Mp * Kp * Ep,
            bytes_accessed=Mp * Kp * 2 + Kp * Ep * 2 + Mp * Ep * 4,
            transcendentals=0),
    )(patches, weight, bias_row)


@partial(jax.jit, static_argnames=(
    "patch_size", "grid_size", "num_patches", "embed_dim", "flatten", "pack"))
def _patch_embed_forward(x, weight, bias_row, *, patch_size, grid_size,
                         num_patches, embed_dim, flatten, pack):
    N, C, D, H, W = x.shape
    pd, ph, pw = patch_size
    Dp, Hp, Wp = grid_size
    K = C * pd * ph * pw
    M = N * num_patches

    # Patchify.  Under jit the f32->bf16 cast fuses with the transpose, so the
    # input is read from HBM once and the bf16 patch matrix written once.
    # TODO(synk): fuse patch extraction into the Pallas kernel via a
    # (1, C, pd, H, W) BlockSpec + in-VMEM relayout to drop this extra HBM pass.
    xb = x.astype(jnp.bfloat16)
    xp = xb.reshape(N, C, Dp, pd, Hp, ph, Wp, pw)
    xp = jnp.transpose(xp, (0, 2, 4, 6, 1, 3, 5, 7))
    patches = xp.reshape(M, K)

    if pack > 1:
        # Row-major free view: `pack` consecutive patch rows per MXU row, matched
        # by the block-diagonal weight -> 128-lane-dense output.
        patches = patches.reshape(M // pack, pack * K)

    out = patch_embed_matmul(patches, weight, bias_row)    # (Mp, Ep) f32

    # (Mp, pack*E) row-major is exactly (M, E) row-major -> direct reshape.
    out = out.reshape(N, num_patches, embed_dim)
    if not flatten:
        # PyTorch permutes before the flatten check, so non-flattened output is
        # channel-last (N, D', H', W', E) — matched here.
        out = out.reshape(N, Dp, Hp, Wp, embed_dim)
    return out


class PatchEmbedding3D:
    """JAX/Pallas equivalent of the PyTorch PatchEmbedding3D (norm = Identity)."""

    def __init__(self, tensor_dhw=(4, 16, 16), patch_size=(2, 8, 8),
                 stride=(2, 8, 8), in_channels=4, embed_dim=32,
                 flatten=True, key=None):
        assert tuple(patch_size) == tuple(stride), \
            "patchify path assumes non-overlapping patches"
        self.tensor_dhw = tuple(tensor_dhw)
        self.patch_size = tuple(patch_size)
        self.stride = tuple(stride)
        self.in_channels = in_channels
        self.embed_dim = embed_dim
        self.flatten = flatten
        self.grid_size = tuple(
            (tensor_dhw[i] - patch_size[i]) // stride[i] + 1 for i in range(3))
        self.num_patches = self.grid_size[0] * self.grid_size[1] * self.grid_size[2]

        # Deterministic parameter init (Conv3d-style kaiming-uniform bounds).
        key = jax.random.PRNGKey(0) if key is None else key
        kw, kb = jax.random.split(key)
        pd, ph, pw = self.patch_size
        K = in_channels * pd * ph * pw
        bound = 1.0 / math.sqrt(K)
        # PyTorch Conv3d weight layout: (embed_dim, C, pd, ph, pw)
        self.weight = jax.random.uniform(
            kw, (embed_dim, in_channels, pd, ph, pw),
            minval=-bound, maxval=bound, dtype=jnp.float32)
        self.bias = jax.random.uniform(
            kb, (embed_dim,), minval=-bound, maxval=bound, dtype=jnp.float32)

        # --- one-time weight prep (kept out of the per-call path) ---
        w_ke_f32 = self.weight.reshape(embed_dim, K).T        # (K, E); k = (C,pd,ph,pw)
        self.w_ke = w_ke_f32.astype(jnp.bfloat16)
        self.bias_row = self.bias.reshape(1, embed_dim).astype(jnp.float32)

        # Lane-dense output packing (only useful when embed_dim < 128 lanes).
        if embed_dim < 128 and 128 % embed_dim == 0:
            self.pack = 128 // embed_dim
            eye = jnp.eye(self.pack, dtype=jnp.float32)
            self.w_packed = jnp.kron(eye, w_ke_f32).astype(jnp.bfloat16)  # (pack*K, 128)
            self.bias_packed = jnp.tile(self.bias, self.pack).reshape(
                1, self.pack * embed_dim).astype(jnp.float32)
        else:
            self.pack = 1
            self.w_packed = self.w_ke
            self.bias_packed = self.bias_row

    def __call__(self, x):
        # x: (N, C, D, H, W) float32
        N, C, D, H, W = x.shape
        assert (D, H, W) == self.tensor_dhw and C == self.in_channels
        M = N * self.num_patches
        pack = self.pack if (self.pack > 1 and M % self.pack == 0) else 1
        weight = self.w_packed if pack > 1 else self.w_ke
        bias_row = self.bias_packed if pack > 1 else self.bias_row
        return _patch_embed_forward(
            x, weight, bias_row,
            patch_size=self.patch_size, grid_size=self.grid_size,
            num_patches=self.num_patches, embed_dim=self.embed_dim,
            flatten=self.flatten, pack=pack)


if __name__ == "__main__":
    # Small shapes consistent with the module: batch=2, channels=4, D=4, H=W=16,
    # patch (2, 8, 8) -> grid (2, 2, 2), num_patches=8, embed_dim=32.
    key = jax.random.PRNGKey(0)
    kx, kp = jax.random.split(key)
    N, C, D, H, W = 2, 4, 4, 16, 16
    x = jax.random.normal(kx, (N, C, D, H, W), dtype=jnp.float32)

    model = PatchEmbedding3D(tensor_dhw=(D, H, W), patch_size=(2, 8, 8),
                             stride=(2, 8, 8), in_channels=C, embed_dim=32, key=kp)
    out = jax.block_until_ready(model(x))

    # Reference check vs. plain-JAX conv-as-matmul in f32 (kernel uses bf16
    # operands with f32 accumulation -> loosened tolerance).
    pd, ph, pw = model.patch_size
    Dp, Hp, Wp = model.grid_size
    xp = x.reshape(N, C, Dp, pd, Hp, ph, Wp, pw)
    xp = jnp.transpose(xp, (0, 2, 4, 6, 1, 3, 5, 7)).reshape(N, model.num_patches, -1)
    ref = jnp.einsum("npk,ek->npe", xp,
                     model.weight.reshape(model.embed_dim, -1)) + model.bias
    assert out.shape == (N, model.num_patches, model.embed_dim)
    err = float(jnp.max(jnp.abs(out - ref)))
    assert jnp.allclose(out, ref, atol=3e-2, rtol=3e-2), f"max abs err {err}"

    print("KERNEL_OK")
</pallas_src>

<mosaic_0001>
module attributes {stable_mosaic.version = 11 : i64} {
  func.func @_patch_embed_kernel(%arg0: i32, %arg1: memref<4x2048xbf16, #tpu.memory_space<vmem>>, %arg2: memref<2048x128xbf16, #tpu.memory_space<vmem>>, %arg3: memref<1x128xf32, #tpu.memory_space<vmem>>, %arg4: memref<4x128xf32, #tpu.memory_space<vmem>>) attributes {dimension_semantics = [#tpu.dimension_semantics<parallel>], iteration_bounds = array<i64: 1>, scalar_prefetch = 0 : i64, scratch_operands = 0 : i64, tpu.core_type = #tpu.core_type<tc>, window_params = [{transform_indices = @transform_0, window_bounds = array<i64: 4, 2048>}, {pipeline_mode = #tpu.pipeline_mode<synchronous>, transform_indices = @transform_1, window_bounds = array<i64: 2048, 128>}, {pipeline_mode = #tpu.pipeline_mode<synchronous>, transform_indices = @transform_2, window_bounds = array<i64: 1, 128>}, {transform_indices = @transform_3, window_bounds = array<i64: 4, 128>}]} {
    %c0 = arith.constant 0 : index
    %c0_0 = arith.constant 0 : index
    %0 = vector.load %arg1[%c0, %c0_0] : memref<4x2048xbf16, #tpu.memory_space<vmem>>, vector<4x2048xbf16>
    %c0_1 = arith.constant 0 : index
    %c0_2 = arith.constant 0 : index
    %1 = vector.load %arg2[%c0_1, %c0_2] : memref<2048x128xbf16, #tpu.memory_space<vmem>>, vector<2048x128xbf16>
    %cst = arith.constant dense<0.000000e+00> : vector<4x128xf32>
    %2 = tpu.matmul %0, %1, %cst {dimension_numbers = #tpu.dot_dimension_numbers<[1], [0], [0], [1], [0, 0, 1, 1], [], []>} : vector<4x2048xbf16>, vector<2048x128xbf16>, vector<4x128xf32> -> vector<4x128xf32>
    %c0_3 = arith.constant 0 : index
    %c0_4 = arith.constant 0 : index
    %3 = vector.load %arg3[%c0_3, %c0_4] : memref<1x128xf32, #tpu.memory_space<vmem>>, vector<1x128xf32>
    %4 = vector.broadcast %3 : vector<1x128xf32> to vector<4x128xf32>
    %5 = arith.addf %2, %4 : vector<4x128xf32>
    %c0_5 = arith.constant 0 : index
    %c0_6 = arith.constant 0 : index
    %6 = vector.load %arg4[%c0_5, %c0_6] : memref<4x128xf32, #tpu.memory_space<vmem>>, vector<4x128xf32>
    tpu.vector_store %arg4[%c0_5, %c0_6], %5 {strides = array<i32>} : memref<4x128xf32, #tpu.memory_space<vmem>>, vector<4x128xf32>,
    return
  }
  func.func @transform_0(%arg0: i32) -> (i32, i32) {
    %c0_i32 = arith.constant 0 : i32
    %c0_i32_0 = arith.constant 0 : i32
    return %arg0, %c0_i32 : i32, i32
  }
  func.func @transform_1(%arg0: i32) -> (i32, i32) {
    %c0_i32 = arith.constant 0 : i32
    %c0_i32_0 = arith.constant 0 : i32
    %c0_i32_1 = arith.constant 0 : i32
    return %c0_i32, %c0_i32_0 : i32, i32
  }
  func.func @transform_2(%arg0: i32) -> (i32, i32) {
    %c0_i32 = arith.constant 0 : i32
    %c0_i32_0 = arith.constant 0 : i32
    %c0_i32_1 = arith.constant 0 : i32
    return %c0_i32, %c0_i32_0 : i32, i32
  }
  func.func @transform_3(%arg0: i32) -> (i32, i32) {
    %c0_i32 = arith.constant 0 : i32
    %c0_i32_0 = arith.constant 0 : i32
    return %arg0, %c0_i32 : i32, i32
  }
}

</mosaic_0001>

<bundles_post_ra>
// kernel: _patch_embed_forward.1
= control target key start
LH: loop header
LB: loop body
LE: loop exit
PB: predicated region body
PF: predicated region fallthrough
CT: control target
= control target key end

     0   :  { %v1901_v22 = vmov 1983009808   ;;  %v290_v24 = vlaneseq  ;;  %s2334_s1 = inlined_call_operand.vmem [shape: bf16[2048,128], index: 1, kind: input, shape index: {}]   ;;  %s2335_s0 = inlined_call_operand.vmem [shape: bf16[4,2048], index: 0, kind: input, shape index: {}]   ;;  %s2336_s2 = inlined_call_operand.vmem [shape: f32[1,128], index: 2, kind: input, shape index: {}]   ;;  %s2337_s3 = inlined_call_operand.vmem [shape: f32[4,128], index: 3, kind: output, shape index: {}]  }
   0x1   :  { %v1769_v0 = vld [vmem:[%s2334_s1 + $0x78] sm:$0xff]   ;;  %v1773_v4 = vld [vmem:[%s2334_s1 + $0x70] sm:$0xff]   ;;  %v1777_v8 = vld [vmem:[%s2334_s1 + $0x68] sm:$0xff]   ;;  %v288_v23 = vunpack.c.l.s4 %v1901_v22 }
   0x2   :  { %v1770_v1 = vld [vmem:[%s2334_s1 + $0xf8] sm:$0xff]   ;;  %1592 = vmatprep.subr.bf16.mxu0 %v1769_v0  ;;  %v1774_v5 = vld [vmem:[%s2334_s1 + $0xf0] sm:$0xff]   ;;  %v1778_v9 = vld [vmem:[%s2334_s1 + $0xe8] sm:$0xff]   ;;  %v291_v30 = vshrl.u32 %v290_v24, 7 }
   0x3   :  { %v1771_v2 = vld [vmem:[%s2334_s1 + $0x38] sm:$0xff]   ;;  %1614 = vmatprep.subr.bf16.mxu1 %v1770_v1  ;;  %v1775_v6 = vld [vmem:[%s2334_s1 + $0x30] sm:$0xff]   ;;  %v1779_v10 = vld [vmem:[%s2334_s1 + $0x28] sm:$0xff]   ;;  %v289_v29 = vunpack.c.0.s8 %v288_v23 }
   0x4   :  { %v1772_v3 = vld [vmem:[%s2334_s1 + $0xb8] sm:$0xff]   ;;  %1593 = vmatpush3.bf16.msra.mxu0 %v1771_v2  ;;  %v1776_v7 = vld [vmem:[%s2334_s1 + $0xb0] sm:$0xff]   ;;  %v1780_v11 = vld [vmem:[%s2334_s1 + $0xa8] sm:$0xff]  }
   0x5   :  { %1615 = vmatpush3.bf16.msra.mxu1 %v1772_v3  ;;  %1594 = vmatprep.subr.bf16.mxu0 %v1773_v4  ;;  %v1781_v12 = vld [vmem:[%s2334_s1 + $0x60] sm:$0xff]   ;;  %v1785_v16 = vld [vmem:[%s2334_s1 + $0x58] sm:$0xff]   ;;  %v1789_v20 = vld [vmem:[%s2334_s1 + $0x50] sm:$0xff]   ;;  %v2012_v35 = vsub.s32 %v289_v29, %v291_v30 }
   0x6   :  { %1616 = vmatprep.subr.bf16.mxu1 %v1774_v5  ;;  %v1782_v13 = vld [vmem:[%s2334_s1 + $0xe0] sm:$0xff]   ;;  %v1786_v17 = vld [vmem:[%s2334_s1 + $0xd8] sm:$0xff]   ;;  %v1790_v21 = vld [vmem:[%s2334_s1 + $0xd0] sm:$0xff]  }
   0x7   :  { %v1783_v14 = vld [vmem:[%s2334_s1 + $0x20] sm:$0xff]   ;;  %v1787_v18 = vld [vmem:[%s2334_s1 + $0x18] sm:$0xff]   ;;  %v1791_v25 = vld [vmem:[%s2334_s1 + $0x10] sm:$0xff]  }
   0x8   :  { %1595 = vmatpush3.bf16.msra.mxu0 %v1775_v6  ;;  %v1784_v15 = vld [vmem:[%s2334_s1 + $0xa0] sm:$0xff]   ;;  %v1788_v19 = vld [vmem:[%s2334_s1 + $0x98] sm:$0xff]   ;;  %v1792_v26 = vld [vmem:[%s2334_s1 + $0x90] sm:$0xff]  }
   0x9   :  { %1617 = vmatpush3.bf16.msra.mxu1 %v1776_v7  ;;  %1596 = vmatprep.subr.bf16.mxu0 %v1777_v8  ;;  %v1793_v27 = vld [vmem:[%s2334_s1 + $0x48] sm:$0xff]   ;;  %v1797_v33 = vld [vmem:[%s2334_s1 + $0x40] sm:$0xff]   ;;  %v1802_v41 = vld [vmem:[%s2334_s1 + $0x178] sm:$0xff]  }
   0xa   :  { %1618 = vmatprep.subr.bf16.mxu1 %v1778_v9  ;;  %v1794_v28 = vld [vmem:[%s2334_s1 + $0xc8] sm:$0xff]   ;;  %v1798_v34 = vld [vmem:[%s2334_s1 + $0xc0] sm:$0xff]   ;;  %v1803_v42 = vld [vmem:[%s2334_s1 + $0x1f8] sm:$0xff]  }
   0xb   :  { %v1795_v31 = vld [vmem:[%s2334_s1 + $0x8] sm:$0xff]   ;;  %v1799_v36 = vld [vmem:[%s2334_s1] sm:$0xff]   ;;  %v1804_v45 = vld [vmem:[%s2334_s1 + $0x138] sm:$0xff]  }
   0xc   :  { %1597 = vmatpush3.bf16.msra.mxu0 %v1779_v10  ;;  %v1796_v32 = vld [vmem:[%s2334_s1 + $0x88] sm:$0xff]   ;;  %v1800_v37 = vld [vmem:[%s2334_s1 + $0x80] sm:$0xff]   ;;  %v1805_v46 = vld [vmem:[%s2334_s1 + $0x1b8] sm:$0xff]  }
   0xd   :  { %1619 = vmatpush3.bf16.msra.mxu1 %v1780_v11  ;;  %1598 = vmatprep.subr.bf16.mxu0 %v1781_v12  ;;  %v15_v38 = vld [vmem:[%s2335_s0] sm:$0xff]  ;;  %v1806_v48 = vld [vmem:[%s2334_s1 + $0x170] sm:$0xff]   ;;  %v1810_v52 = vld [vmem:[%s2334_s1 + $0x168] sm:$0xff]  }
   0xe   :  { %1620 = vmatprep.subr.bf16.mxu1 %v1782_v13  ;;  %v293_v39 = vrot.slane %v15_v38, %v2012_v35  ;;  %v286_v40 = vcombine.high %v15_v38, %v15_v38  ;;  %v1807_v49 = vld [vmem:[%s2334_s1 + $0x1f0] sm:$0xff]   ;;  %v1811_v53 = vld [vmem:[%s2334_s1 + $0x1e8] sm:$0xff]   ;;  %v1814_v56 = vld [vmem:[%s2334_s1 + $0x160] sm:$0xff]  }
   0xf   :  { %v1808_v50 = vld [vmem:[%s2334_s1 + $0x130] sm:$0xff]   ;;  %v1812_v54 = vld [vmem:[%s2334_s1 + $0x128] sm:$0xff]   ;;  %v1815_v57 = vld [vmem:[%s2334_s1 + $0x1e0] sm:$0xff]  }
  0x10   :  { %1599 = vmatpush3.bf16.msra.mxu0 %v1783_v14  ;;  %v301_v43 = vcombine.high %v293_v39, %v293_v39  ;;  %v300_v44 = vrot.slane %v286_v40, %v2012_v35  ;;  %v1809_v51 = vld [vmem:[%s2334_s1 + $0x1b0] sm:$0xff]   ;;  %v1813_v55 = vld [vmem:[%s2334_s1 + $0x1a8] sm:$0xff]   ;;  %v1816_v58 = vld [vmem:[%s2334_s1 + $0x120] sm:$0xff]  }
  0x11   :  { %1621 = vmatpush3.bf16.msra.mxu1 %v1784_v15  ;;  %1600 = vmatprep.subr.bf16.mxu0 %v1785_v16  ;;  %v1817_v59 = vld [vmem:[%s2334_s1 + $0x1a0] sm:$0xff]   ;;  %v1818_v60 = vld [vmem:[%s2334_s1 + $0x158] sm:$0xff]   ;;  %v1822_v0 = vld [vmem:[%s2334_s1 + $0x150] sm:$0xff]  }
  0x12   :  { %1622 = vmatprep.subr.bf16.mxu1 %v1786_v17  ;;  %1170 = vmatprep.mubr.bf16.mxu0 %v301_v43  ;;  %v302_v47 = vcombine.high %v300_v44, %v300_v44  ;;  %v1819_v61 = vld [vmem:[%s2334_s1 + $0x1d8] sm:$0xff]   ;;  %v1823_v1 = vld [vmem:[%s2334_s1 + $0x1d0] sm:$0xff]   ;;  %v1826_v4 = vld [vmem:[%s2334_s1 + $0x148] sm:$0xff]  }
  0x13   :  { %v1820_v62 = vld [vmem:[%s2334_s1 + $0x118] sm:$0xff]   ;;  %v1824_v2 = vld [vmem:[%s2334_s1 + $0x110] sm:$0xff]   ;;  %v1827_v5 = vld [vmem:[%s2334_s1 + $0x1c8] sm:$0xff]  }
  0x14   :  { %1601 = vmatpush3.bf16.msra.mxu0 %v1787_v18  ;;  %1210 = vmatprep.mubr.bf16.mxu1 %v302_v47  ;;  %v1821_v63 = vld [vmem:[%s2334_s1 + $0x198] sm:$0xff]   ;;  %v1825_v3 = vld [vmem:[%s2334_s1 + $0x190] sm:$0xff]   ;;  %v1828_v6 = vld [vmem:[%s2334_s1 + $0x108] sm:$0xff]  }
  0x15   :  { %1623 = vmatpush3.bf16.msra.mxu1 %v1788_v19  ;;  %1602 = vmatprep.subr.bf16.mxu0 %v1789_v20  ;;  %v1829_v7 = vld [vmem:[%s2334_s1 + $0x188] sm:$0xff]   ;;  %v1830_v8 = vld [vmem:[%s2334_s1 + $0x140] sm:$0xff]   ;;  %v1835_v15 = vld [vmem:[%s2334_s1 + $0x278] sm:$0xff]  }
  0x16   :  { %1624 = vmatprep.subr.bf16.mxu1 %v1790_v21  ;;  %v1831_v9 = vld [vmem:[%s2334_s1 + $0x1c0] sm:$0xff]   ;;  %v16_v12 = vld [vmem:[%s2335_s0 + $0x8] sm:$0xff]  ;;  %v1836_v16 = vld [vmem:[%s2334_s1 + $0x2f8] sm:$0xff]  }
  0x17   :  { %v1832_v10 = vld [vmem:[%s2334_s1 + $0x100] sm:$0xff]   ;;  %v310_v13 = vrot.slane %v16_v12, %v2012_v35  ;;  %v303_v14 = vcombine.high %v16_v12, %v16_v12  ;;  %v1837_v19 = vld [vmem:[%s2334_s1 + $0x238] sm:$0xff]   ;;  %v1839_v22 = vld [vmem:[%s2334_s1 + $0x270] sm:$0xff]  }
  0x18   :  { %1603 = vmatpush3.bf16.msra.mxu0 %v1791_v25  ;;  %v1833_v11 = vld [vmem:[%s2334_s1 + $0x180] sm:$0xff]   ;;  %v1838_v20 = vld [vmem:[%s2334_s1 + $0x2b8] sm:$0xff]   ;;  %v1840_v23 = vld [vmem:[%s2334_s1 + $0x2f0] sm:$0xff]  }
  0x19   :  { %1625 = vmatpush3.bf16.msra.mxu1 %v1792_v26  ;;  %1604 = vmatprep.subr.bf16.mxu0 %v1793_v27  ;;  %v318_v17 = vcombine.high %v310_v13, %v310_v13  ;;  %v317_v18 = vrot.slane %v303_v14, %v2012_v35  ;;  %v1841_v24 = vld [vmem:[%s2334_s1 + $0x230] sm:$0xff]   ;;  %v1843_v26 = vld [vmem:[%s2334_s1 + $0x268] sm:$0xff]   ;;  %v1847_v30 = vld [vmem:[%s2334_s1 + $0x260] sm:$0xff]  }
  0x1a   :  { %1626 = vmatprep.subr.bf16.mxu1 %v1794_v28  ;;  %v1842_v25 = vld [vmem:[%s2334_s1 + $0x2b0] sm:$0xff]   ;;  %v1844_v27 = vld [vmem:[%s2334_s1 + $0x2e8] sm:$0xff]   ;;  %v1854_v38 = vld [vmem:[%s2334_s1 + $0x298] sm:$0xff]  }
  0x1b   :  { %v319_v21 = vcombine.high %v317_v18, %v317_v18  ;;  %v1845_v28 = vld [vmem:[%s2334_s1 + $0x228] sm:$0xff]   ;;  %v1856_v40 = vld [vmem:[%s2334_s1 + $0x2d0] sm:$0xff]   ;;  %v1863_v47 = vld [vmem:[%s2334_s1 + $0x240] sm:$0xff]  }
  0x1c   :  { %1605 = vmatpush3.bf16.msra.mxu0 %v1795_v31  ;;  %v1846_v29 = vld [vmem:[%s2334_s1 + $0x2a8] sm:$0xff]   ;;  %v1848_v31 = vld [vmem:[%s2334_s1 + $0x2e0] sm:$0xff]   ;;  %v1887_v12 = vld [vmem:[%s2334_s1 + $0x398] sm:$0xff]  }
  0x1d   :  { %1627 = vmatpush3.bf16.msra.mxu1 %v1796_v32  ;;  %1606 = vmatprep.subr.bf16.mxu0 %v1797_v33  ;;  %v1849_v32 = vld [vmem:[%s2334_s1 + $0x220] sm:$0xff]   ;;  %v1859_v43 = vld [vmem:[%s2334_s1 + $0x248] sm:$0xff]   ;;  %v1889_v14 = vld [vmem:[%s2334_s1 + $0x3d0] sm:$0xff]  }
  0x1e   :  { %1628 = vmatprep.subr.bf16.mxu1 %v1798_v34  ;;  %v1850_v33 = vld [vmem:[%s2334_s1 + $0x2a0] sm:$0xff]   ;;  %v1851_v34 = vld [vmem:[%s2334_s1 + $0x258] sm:$0xff]  }
  0x20   :  { %1607 = vmatpush3.bf16.msra.mxu0 %v1799_v36  ;;  %v1852_v36 = vld [vmem:[%s2334_s1 + $0x2d8] sm:$0xff]  }
  0x21   :  { %1629 = vmatpush3.bf16.msra.mxu1 %v1800_v37  ;;  %1636 = vmatprep.subr.bf16.mxu0 %v1802_v41  ;;  %v1853_v37 = vld [vmem:[%s2334_s1 + $0x218] sm:$0xff]   ;;  %v1857_v41 = vld [vmem:[%s2334_s1 + $0x210] sm:$0xff]  }
  0x22   :  { %1658 = vmatprep.subr.bf16.mxu1 %v1803_v42  ;;  %v1858_v42 = vld [vmem:[%s2334_s1 + $0x290] sm:$0xff]  }
  0x23   :  { %1171 = vmatmul.mubr.bf16.vlgmr.msra.gmra.mxu0 %v293_v39  ;;  %v1855_v39 = vld [vmem:[%s2334_s1 + $0x250] sm:$0xff]  }
  0x24   :  { %1637 = vmatpush3.bf16.msra.mxu0 %v1804_v45  ;;  %1211 = vmatmul.mubr.bf16.vlgmr.msra.gmra.mxu1 %v300_v44  ;;  %v1860_v44 = vld [vmem:[%s2334_s1 + $0x2c8] sm:$0xff]  }
  0x25   :  { %1638 = vmatprep.subr.bf16.mxu0 %v1806_v48  ;;  %1659 = vmatpush3.bf16.msra.mxu1 %v1805_v46  ;;  %v1861_v45 = vld [vmem:[%s2334_s1 + $0x208] sm:$0xff]   ;;  %v1864_v48 = vld [vmem:[%s2334_s1 + $0x2c0] sm:$0xff]  }
  0x26   :  { %1660 = vmatprep.subr.bf16.mxu1 %v1807_v49  ;;  %1250 = vmatprep.mubr.bf16.mxu0 %v318_v17  ;;  %v1862_v46 = vld [vmem:[%s2334_s1 + $0x288] sm:$0xff]   ;;  %v1865_v49 = vld [vmem:[%s2334_s1 + $0x200] sm:$0xff]  }
  0x27   :  { %1290 = vmatprep.mubr.bf16.mxu1 %v319_v21  ;;  %v1892_v17 = vld [vmem:[%s2334_s1 + $0x348] sm:$0xff]   ;;  %v1896_v21 = vld [vmem:[%s2334_s1 + $0x340] sm:$0xff]  }
  0x28   :  { %1639 = vmatpush3.bf16.msra.mxu0 %v1808_v50  ;;  %v1866_v50 = vld [vmem:[%s2334_s1 + $0x280] sm:$0xff]  }
  0x29   :  { %1640 = vmatprep.subr.bf16.mxu0 %v1810_v52  ;;  %1661 = vmatpush3.bf16.msra.mxu1 %v1809_v51  ;;  %v17_v51 = vld [vmem:[%s2335_s0 + $0x10] sm:$0xff] }
  0x2a   :  { %1662 = vmatprep.subr.bf16.mxu1 %v1811_v53  ;;  %v327_v52 = vrot.slane %v17_v51, %v2012_v35  ;;  %v320_v53 = vcombine.high %v17_v51, %v17_v51 }
  0x2c   :  { %1641 = vmatpush3.bf16.msra.mxu0 %v1812_v54  ;;  %v1868_v54 = vld [vmem:[%s2334_s1 + $0x378] sm:$0xff]  }
  0x2d   :  { %1642 = vmatprep.subr.bf16.mxu0 %v1814_v56  ;;  %1663 = vmatpush3.bf16.msra.mxu1 %v1813_v55  ;;  %v1869_v55 = vld [vmem:[%s2334_s1 + $0x3f8] sm:$0xff]   ;;  %v335_v56 = vcombine.high %v327_v52, %v327_v52 }
  0x2e   :  { %1664 = vmatprep.subr.bf16.mxu1 %v1815_v57  ;;  %v334_v57 = vrot.slane %v320_v53, %v2012_v35 }
  0x30   :  { %1643 = vmatpush3.bf16.msra.mxu0 %v1816_v58  ;;  %v1870_v58 = vld [vmem:[%s2334_s1 + $0x338] sm:$0xff]  }
  0x31   :  { %1644 = vmatprep.subr.bf16.mxu0 %v1818_v60  ;;  %1665 = vmatpush3.bf16.msra.mxu1 %v1817_v59  ;;  %v1871_v59 = vld [vmem:[%s2334_s1 + $0x3b8] sm:$0xff]   ;;  %v336_v60 = vcombine.high %v334_v57, %v334_v57 }
  0x32   :  { %1666 = vmatprep.subr.bf16.mxu1 %v1819_v61  ;;  %v1872_v61 = vld [vmem:[%s2334_s1 + $0x370] sm:$0xff]  }
  0x34   :  { %1645 = vmatpush3.bf16.msra.mxu0 %v1820_v62  ;;  %v1873_v62 = vld [vmem:[%s2334_s1 + $0x3f0] sm:$0xff]  }
  0x35   :  { %1646 = vmatprep.subr.bf16.mxu0 %v1822_v0  ;;  %1667 = vmatpush3.bf16.msra.mxu1 %v1821_v63  ;;  %v1874_v63 = vld [vmem:[%s2334_s1 + $0x330] sm:$0xff]  }
  0x36   :  { %1668 = vmatprep.subr.bf16.mxu1 %v1823_v1  ;;  %v1875_v0 = vld [vmem:[%s2334_s1 + $0x3b0] sm:$0xff]   ;;  %v1876_v1 = vld [vmem:[%s2334_s1 + $0x368] sm:$0xff]  }
  0x38   :  { %1647 = vmatpush3.bf16.msra.mxu0 %v1824_v2  ;;  %v1877_v2 = vld [vmem:[%s2334_s1 + $0x3e8] sm:$0xff]  }
  0x39   :  { %1648 = vmatprep.subr.bf16.mxu0 %v1826_v4  ;;  %1669 = vmatpush3.bf16.msra.mxu1 %v1825_v3  ;;  %v1878_v3 = vld [vmem:[%s2334_s1 + $0x328] sm:$0xff]  }
  0x3a   :  { %1670 = vmatprep.subr.bf16.mxu1 %v1827_v5  ;;  %v1879_v4 = vld [vmem:[%s2334_s1 + $0x3a8] sm:$0xff]   ;;  %v1880_v5 = vld [vmem:[%s2334_s1 + $0x360] sm:$0xff]  }
  0x3c   :  { %1649 = vmatpush3.bf16.msra.mxu0 %v1828_v6  ;;  %v1881_v6 = vld [vmem:[%s2334_s1 + $0x3e0] sm:$0xff]  }
  0x3d   :  { %1650 = vmatprep.subr.bf16.mxu0 %v1830_v8  ;;  %1671 = vmatpush3.bf16.msra.mxu1 %v1829_v7  ;;  %v1882_v7 = vld [vmem:[%s2334_s1 + $0x320] sm:$0xff]  }
  0x3e   :  { %1672 = vmatprep.subr.bf16.mxu1 %v1831_v9  ;;  %v1883_v8 = vld [vmem:[%s2334_s1 + $0x3a0] sm:$0xff]   ;;  %v1884_v9 = vld [vmem:[%s2334_s1 + $0x358] sm:$0xff]  }
  0x40   :  { %1651 = vmatpush3.bf16.msra.mxu0 %v1832_v10  ;;  %v1885_v10 = vld [vmem:[%s2334_s1 + $0x3d8] sm:$0xff]  }
  0x41   :  { %1680 = vmatprep.subr.bf16.mxu0 %v1835_v15  ;;  %1673 = vmatpush3.bf16.msra.mxu1 %v1833_v11  ;;  %v1886_v11 = vld [vmem:[%s2334_s1 + $0x318] sm:$0xff]   ;;  %v1890_v15 = vld [vmem:[%s2334_s1 + $0x310] sm:$0xff]  }
  0x42   :  { %1702 = vmatprep.subr.bf16.mxu1 %v1836_v16  ;;  %v1891_v16 = vld [vmem:[%s2334_s1 + $0x390] sm:$0xff]  }
  0x43   :  { %1251 = vmatmul.mubr.bf16.vlgmr.msra.gmra.mxu0 %v310_v13  ;;  %v1888_v13 = vld [vmem:[%s2334_s1 + $0x350] sm:$0xff]  }
  0x44   :  { %1681 = vmatpush3.bf16.msra.mxu0 %v1837_v19  ;;  %1291 = vmatmul.mubr.bf16.vlgmr.msra.gmra.mxu1 %v317_v18  ;;  %v1893_v18 = vld [vmem:[%s2334_s1 + $0x3c8] sm:$0xff]  }
  0x45   :  { %1682 = vmatprep.subr.bf16.mxu0 %v1839_v22  ;;  %1703 = vmatpush3.bf16.msra.mxu1 %v1838_v20  ;;  %v1894_v19 = vld [vmem:[%s2334_s1 + $0x308] sm:$0xff]   ;;  %v1897_v22 = vld [vmem:[%s2334_s1 + $0x3c0] sm:$0xff]  }
  0x46   :  { %1704 = vmatprep.subr.bf16.mxu1 %v1840_v23  ;;  %1330 = vmatprep.mubr.bf16.mxu0 %v335_v56  ;;  %v1895_v20 = vld [vmem:[%s2334_s1 + $0x388] sm:$0xff]   ;;  %v1898_v23 = vld [vmem:[%s2334_s1 + $0x300] sm:$0xff]  }
  0x47   :  { %1370 = vmatprep.mubr.bf16.mxu1 %v336_v60 }
  0x48   :  { %1683 = vmatpush3.bf16.msra.mxu0 %v1841_v24  ;;  %v1899_v24 = vld [vmem:[%s2334_s1 + $0x380] sm:$0xff]  }
  0x49   :  { %1684 = vmatprep.subr.bf16.mxu0 %v1843_v26  ;;  %1705 = vmatpush3.bf16.msra.mxu1 %v1842_v25  ;;  %v18_v25 = vld [vmem:[%s2335_s0 + $0x18] sm:$0xff] }
  0x4a   :  { %1706 = vmatprep.subr.bf16.mxu1 %v1844_v27  ;;  %v344_v26 = vrot.slane %v18_v25, %v2012_v35  ;;  %v337_v27 = vcombine.high %v18_v25, %v18_v25 }
  0x4c   :  { %1685 = vmatpush3.bf16.msra.mxu0 %v1845_v28  ;;  %v352_v28 = vcombine.high %v344_v26, %v344_v26 }
  0x4d   :  { %1686 = vmatprep.subr.bf16.mxu0 %v1847_v30  ;;  %1707 = vmatpush3.bf16.msra.mxu1 %v1846_v29  ;;  %v351_v29 = vrot.slane %v337_v27, %v2012_v35 }
  0x4e   :  { %1708 = vmatprep.subr.bf16.mxu1 %v1848_v31 }
  0x4f   :  { %v353_v30 = vcombine.high %v351_v29, %v351_v29 }
  0x50   :  { %1687 = vmatpush3.bf16.msra.mxu0 %v1849_v32 }
  0x51   :  { %1688 = vmatprep.subr.bf16.mxu0 %v1851_v34  ;;  %1709 = vmatpush3.bf16.msra.mxu1 %v1850_v33  ;;  %v1463_v33 = vld [vmem:[%s2336_s2] ss:$0 sm:$0xff] }
  0x52   :  { %1710 = vmatprep.subr.bf16.mxu1 %v1852_v36 }
  0x54   :  { %1689 = vmatpush3.bf16.msra.mxu0 %v1853_v37 }
  0x55   :  { %1690 = vmatprep.subr.bf16.mxu0 %v1855_v39  ;;  %1711 = vmatpush3.bf16.msra.mxu1 %v1854_v38 }
  0x56   :  { %1712 = vmatprep.subr.bf16.mxu1 %v1856_v40 }
  0x58   :  { %1691 = vmatpush3.bf16.msra.mxu0 %v1857_v41 }
  0x59   :  { %1692 = vmatprep.subr.bf16.mxu0 %v1859_v43  ;;  %1713 = vmatpush3.bf16.msra.mxu1 %v1858_v42 }
  0x5a   :  { %1714 = vmatprep.subr.bf16.mxu1 %v1860_v44 }
  0x5c   :  { %1693 = vmatpush3.bf16.msra.mxu0 %v1861_v45 }
  0x5d   :  { %1694 = vmatprep.subr.bf16.mxu0 %v1863_v47  ;;  %1715 = vmatpush3.bf16.msra.mxu1 %v1862_v46 }
  0x5e   :  { %1716 = vmatprep.subr.bf16.mxu1 %v1864_v48 }
  0x60   :  { %1695 = vmatpush3.bf16.msra.mxu0 %v1865_v49 }
  0x61   :  { %1724 = vmatprep.subr.bf16.mxu0 %v1868_v54  ;;  %1717 = vmatpush3.bf16.msra.mxu1 %v1866_v50 }
  0x62   :  { %1746 = vmatprep.subr.bf16.mxu1 %v1869_v55 }
  0x63   :  { %1331 = vmatmul.mubr.bf16.vlgmr.msra.gmra.mxu0 %v327_v52 }
  0x64   :  { %1725 = vmatpush3.bf16.msra.mxu0 %v1870_v58  ;;  %1371 = vmatmul.mubr.bf16.vlgmr.msra.gmra.mxu1 %v334_v57 }
  0x65   :  { %1726 = vmatprep.subr.bf16.mxu0 %v1872_v61  ;;  %1747 = vmatpush3.bf16.msra.mxu1 %v1871_v59 }
  0x66   :  { %1748 = vmatprep.subr.bf16.mxu1 %v1873_v62  ;;  %1410 = vmatprep.mubr.bf16.mxu0 %v352_v28 }
  0x67   :  { %1450 = vmatprep.mubr.bf16.mxu1 %v353_v30 }
  0x68   :  { %1727 = vmatpush3.bf16.msra.mxu0 %v1874_v63 }
  0x69   :  { %1728 = vmatprep.subr.bf16.mxu0 %v1876_v1  ;;  %1749 = vmatpush3.bf16.msra.mxu1 %v1875_v0 }
  0x6a   :  { %1750 = vmatprep.subr.bf16.mxu1 %v1877_v2 }
  0x6c   :  { %1729 = vmatpush3.bf16.msra.mxu0 %v1878_v3 }
  0x6d   :  { %1730 = vmatprep.subr.bf16.mxu0 %v1880_v5  ;;  %1751 = vmatpush3.bf16.msra.mxu1 %v1879_v4 }
  0x6e   :  { %1752 = vmatprep.subr.bf16.mxu1 %v1881_v6 }
  0x70   :  { %1731 = vmatpush3.bf16.msra.mxu0 %v1882_v7 }
  0x71   :  { %1732 = vmatprep.subr.bf16.mxu0 %v1884_v9  ;;  %1753 = vmatpush3.bf16.msra.mxu1 %v1883_v8 }
  0x72   :  { %1754 = vmatprep.subr.bf16.mxu1 %v1885_v10 }
  0x74   :  { %1733 = vmatpush3.bf16.msra.mxu0 %v1886_v11 }
  0x75   :  { %1734 = vmatprep.subr.bf16.mxu0 %v1888_v13  ;;  %1755 = vmatpush3.bf16.msra.mxu1 %v1887_v12 }
  0x76   :  { %1756 = vmatprep.subr.bf16.mxu1 %v1889_v14 }
  0x78   :  { %1735 = vmatpush3.bf16.msra.mxu0 %v1890_v15 }
  0x79   :  { %1736 = vmatprep.subr.bf16.mxu0 %v1892_v17  ;;  %1757 = vmatpush3.bf16.msra.mxu1 %v1891_v16 }
  0x7a   :  { %1758 = vmatprep.subr.bf16.mxu1 %v1893_v18 }
  0x7c   :  { %1737 = vmatpush3.bf16.msra.mxu0 %v1894_v19 }
  0x7d   :  { %1738 = vmatprep.subr.bf16.mxu0 %v1896_v21  ;;  %1759 = vmatpush3.bf16.msra.mxu1 %v1895_v20 }
  0x7e   :  { %1760 = vmatprep.subr.bf16.mxu1 %v1897_v22 }
  0x80   :  { %1739 = vmatpush3.bf16.msra.mxu0 %v1898_v23 }
  0x81   :  { %1761 = vmatpush3.bf16.msra.mxu1 %v1899_v24 }
  0x83   :  { %1411 = vmatmul.mubr.bf16.vlgmr.msra.gmra.mxu0 %v344_v26 }
  0x84   :  { %1451 = vmatmul.mubr.bf16.vlgmr.msra.gmra.mxu1 %v351_v29 }
  0xe3   :  { %v1608_v31 = vpop.f32.mrf.mxu0 }
  0xe4   :  { %v1630_v32 = vpop.f32.mrf.mxu1 }
  0xe5   :  { %v1609_v34 = vpop.f32.mrf.mxu0 }
  0xe6   :  { %v1610_v36 = vadd.f32 %v1609_v34, %v1608_v31  ;;  %v1631_v37 = vpop.f32.mrf.mxu1 }
  0xe7   :  { %v1611_v38 = vpop.f32.mrf.mxu0  ;;  %v1632_v40 = vadd.f32 %v1631_v37, %v1630_v32 }
  0xe8   :  { %v1173_v39 = vadd.f32 %v1610_v36, %v1463_v33  ;;  %v1633_v41 = vpop.f32.mrf.mxu1 }
  0xe9   :  { %v1612_v35 = vpop.f32.mrf.mxu0 }
  0xea   :  { %v1213_v42 = vadd.f32 %v1632_v40, %v1173_v39  ;;  %v1634_v43 = vpop.f32.mrf.mxu1 }
 0x103   :  { %v1652_v44 = vpop.f32.mrf.mxu0 }
 0x104   :  { %v1674_v45 = vpop.f32.mrf.mxu1 }
 0x105   :  { %v1653_v46 = vpop.f32.mrf.mxu0 }
 0x106   :  { %v1675_v47 = vpop.f32.mrf.mxu1  ;;  %v1654_v60 = vadd.f32 %v1653_v46, %v1652_v44 }
 0x107   :  { %v1655_v48 = vpop.f32.mrf.mxu0  ;;  %v1676_v62 = vadd.f32 %v1675_v47, %v1674_v45 }
 0x108   :  { %v1677_v49 = vpop.f32.mrf.mxu1  ;;  %v1253_v61 = vadd.f32 %v1654_v60, %v1213_v42 }
 0x109   :  { %v1656_v50 = vpop.f32.mrf.mxu0 }
 0x10a   :  { %v1678_v51 = vpop.f32.mrf.mxu1  ;;  %v1293_v0 = vadd.f32 %v1676_v62, %v1253_v61 }
 0x123   :  { %v1696_v52 = vpop.f32.mrf.mxu0 }
 0x124   :  { %v1718_v53 = vpop.f32.mrf.mxu1 }
 0x125   :  { %v1697_v54 = vpop.f32.mrf.mxu0 }
 0x126   :  { %v1719_v55 = vpop.f32.mrf.mxu1  ;;  %v1698_v63 = vadd.f32 %v1697_v54, %v1696_v52 }
 0x127   :  { %v1699_v56 = vpop.f32.mrf.mxu0  ;;  %v1720_v2 = vadd.f32 %v1719_v55, %v1718_v53 }
 0x128   :  { %v1721_v57 = vpop.f32.mrf.mxu1  ;;  %v1333_v1 = vadd.f32 %v1698_v63, %v1293_v0 }
 0x129   :  { %v1700_v58 = vpop.f32.mrf.mxu0 }
 0x12a   :  { %v1722_v59 = vpop.f32.mrf.mxu1  ;;  %v1373_v6 = vadd.f32 %v1720_v2, %v1333_v1 }
 0x143   :  { %v1740_v3 = vpop.f32.mrf.mxu0 }
 0x144   :  { %v1762_v4 = vpop.f32.mrf.mxu1 }
 0x145   :  { %v1741_v5 = vpop.f32.mrf.mxu0 }
 0x146   :  { %v1742_v7 = vadd.f32 %v1741_v5, %v1740_v3  ;;  %v1763_v8 = vpop.f32.mrf.mxu1 }
 0x147   :  { %v1743_v9 = vpop.f32.mrf.mxu0  ;;  %v1764_v11 = vadd.f32 %v1763_v8, %v1762_v4 }
 0x148   :  { %v1413_v10 = vadd.f32 %v1742_v7, %v1373_v6  ;;  %v1765_v12 = vpop.f32.mrf.mxu1 }
 0x149   :  { %v1744_v13 = vpop.f32.mrf.mxu0 }
 0x14a   :  { %v1453_v14 = vadd.f32 %v1764_v11, %v1413_v10  ;;  %v1766_v15 = vpop.f32.mrf.mxu1 }
 0x14c   :  { %1458 = vst [vmem:[%s2337_s3] sm:$0xf] %v1453_v14 }

</bundles_post_ra>
